<compile_context>
chip_gen: v7x
topology: tpu7x:2x2x1
jax: 0.10.0
libtpu: 0.0.40
codegen_flags: <defaults>
</compile_context>

<pallas_src>
import jax
import jax.numpy as jnp
from jax.experimental import pallas as pl
from jax.experimental.pallas import tpu as pltpu


def _droppath_kernel(scale_ref, x_ref, o_ref):
    # (TB, TR, 128) tile * per-sample (TB, 1, 1) scale, broadcast in-register.
    o_ref[...] = x_ref[...] * scale_ref[...].astype(x_ref.dtype)


def drop_path_forward(x, *, drop_prob, training, key):
    """Pallas DropPath forward; mirrors the PyTorch module's forward()."""
    if drop_prob == 0.0 or not training:
        return x                                   # identity path
    if drop_prob >= 1.0:
        # keep_prob == 0: the PyTorch reference divides by zero (NaN); every
        # sample is dropped with probability 1, so return zeros instead.
        return jnp.zeros_like(x)
    keep_prob = 1.0 - drop_prob

    B = x.shape[0]
    M = 1
    for d in x.shape[1:]:
        M *= d

    # Per-sample Bernoulli drawn in the wrapper (decoupled from tiling).
    u = jax.random.uniform(key, (B,), dtype=jnp.float32)
    binary = jnp.floor(keep_prob + u)                       # {0., 1.}
    scale = (binary / keep_prob).reshape(B, 1, 1)           # 0.0 or 1/keep_prob

    # Lane-dense layout: pad flattened feature dim to a multiple of 128.
    LANE = 128
    M_pad = ((M + LANE - 1) // LANE) * LANE
    xf = x.reshape(B, M)
    if M_pad != M:
        xf = jnp.pad(xf, ((0, 0), (0, M_pad - M)))
    R = M_pad // LANE
    xr = xf.reshape(B, R, LANE)

    # Tile selection: ~2 MiB per input tile.  Batch several samples per step
    # when samples are small; tile the row axis when a single sample is large.
    itemsize = jnp.dtype(x.dtype).itemsize
    target_bytes = 2 * 1024 * 1024
    sample_bytes = R * LANE * itemsize
    if sample_bytes >= target_bytes:
        TB = 1
        TR = max(8, (target_bytes // (LANE * itemsize)) // 8 * 8)
        TR = min(TR, R)
    else:
        TB = min(B, max(1, target_bytes // max(sample_bytes, 1)))
        TR = R
    grid = (pl.cdiv(B, TB), pl.cdiv(R, TR))

    out = pl.pallas_call(
        _droppath_kernel,
        out_shape=jax.ShapeDtypeStruct((B, R, LANE), x.dtype),
        grid=grid,
        in_specs=[
            pl.BlockSpec((TB, 1, 1), lambda i, j: (i, 0, 0)),       # scale
            pl.BlockSpec((TB, TR, LANE), lambda i, j: (i, j, 0)),   # x
        ],
        out_specs=pl.BlockSpec((TB, TR, LANE), lambda i, j: (i, j, 0)),
        compiler_params=pltpu.CompilerParams(
            dimension_semantics=("parallel", "parallel"),
            vmem_limit_bytes=32 * 1024 * 1024,
        ),
    )(scale, xr)

    out = out.reshape(B, M_pad)
    if M_pad != M:
        out = out[:, :M]
    return out.reshape(x.shape)


if __name__ == "__main__":
    B, C, H, W = 8, 4, 16, 16
    drop_prob = 0.3
    keep_prob = 1.0 - drop_prob

    key = jax.random.PRNGKey(0)
    kx, kd = jax.random.split(key)
    x = jax.random.normal(kx, (B, C, H, W), jnp.float32)

    # Training mode: per-sample stochastic depth.
    out = drop_path_forward(x, drop_prob=drop_prob, training=True, key=kd)
    out = jax.block_until_ready(out)
    assert out.shape == x.shape, out.shape
    assert bool(jnp.all(jnp.isfinite(out)))

    # Structural check: every sample is either exactly dropped (all zeros)
    # or exactly x[b] / keep_prob.
    for b in range(B):
        ob = out[b]
        is_drop = bool(jnp.max(jnp.abs(ob)) == 0.0)
        is_keep = bool(jnp.allclose(ob, x[b] / keep_prob, rtol=1e-6, atol=1e-6))
        assert is_drop or is_keep, f"sample {b} is neither dropped nor kept/scaled"

    # Exact reproduction of the wrapper-side Bernoulli decisions.
    u = jax.random.uniform(kd, (B,), dtype=jnp.float32)
    ref = x * (jnp.floor(keep_prob + u) / keep_prob).reshape(B, 1, 1, 1)
    assert bool(jnp.allclose(out, ref, rtol=1e-6, atol=1e-6))

    # Padding path: flattened feature size (3*5*7 = 105) not a multiple of 128.
    x2 = jax.random.normal(kx, (4, 3, 5, 7), jnp.float32)
    out2 = jax.block_until_ready(
        drop_path_forward(x2, drop_prob=drop_prob, training=True, key=kd))
    assert out2.shape == x2.shape
    u2 = jax.random.uniform(kd, (4,), dtype=jnp.float32)
    ref2 = x2 * (jnp.floor(keep_prob + u2) / keep_prob).reshape(4, 1, 1, 1)
    assert bool(jnp.allclose(out2, ref2, rtol=1e-6, atol=1e-6))

    # Eval mode and drop_prob == 0.0 are identities, like the PyTorch module.
    out_eval = drop_path_forward(x, drop_prob=drop_prob, training=False, key=kd)
    assert bool(jnp.all(out_eval == x))
    out_p0 = drop_path_forward(x, drop_prob=0.0, training=True, key=kd)
    assert bool(jnp.all(out_p0 == x))

    print("KERNEL_OK")
</pallas_src>

<mosaic_0001>
module attributes {stable_mosaic.version = 11 : i64} {
  func.func @_droppath_kernel(%arg0: i32, %arg1: i32, %arg2: memref<8x1x1xf32, #tpu.memory_space<vmem>>, %arg3: memref<8x8x128xf32, #tpu.memory_space<vmem>>, %arg4: memref<8x8x128xf32, #tpu.memory_space<vmem>>) attributes {dimension_semantics = [#tpu.dimension_semantics<parallel>, #tpu.dimension_semantics<parallel>], iteration_bounds = array<i64: 1, 1>, scalar_prefetch = 0 : i64, scratch_operands = 0 : i64, tpu.core_type = #tpu.core_type<tc>, window_params = [{transform_indices = @transform_0, window_bounds = array<i64: 8, 1, 1>}, {transform_indices = @transform_1, window_bounds = array<i64: 8, 8, 128>}, {transform_indices = @transform_2, window_bounds = array<i64: 8, 8, 128>}]} {
    %c0 = arith.constant 0 : index
    %c0_0 = arith.constant 0 : index
    %c0_1 = arith.constant 0 : index
    %0 = vector.load %arg3[%c0, %c0_0, %c0_1] : memref<8x8x128xf32, #tpu.memory_space<vmem>>, vector<8x8x128xf32>
    %c0_2 = arith.constant 0 : index
    %c0_3 = arith.constant 0 : index
    %c0_4 = arith.constant 0 : index
    %1 = vector.load %arg2[%c0_2, %c0_3, %c0_4] : memref<8x1x1xf32, #tpu.memory_space<vmem>>, vector<8x1x1xf32>
    %2 = vector.broadcast %1 : vector<8x1x1xf32> to vector<8x8x128xf32>
    %3 = arith.mulf %0, %2 : vector<8x8x128xf32>
    %c0_5 = arith.constant 0 : index
    %c0_6 = arith.constant 0 : index
    %c0_7 = arith.constant 0 : index
    %4 = vector.load %arg4[%c0_5, %c0_6, %c0_7] : memref<8x8x128xf32, #tpu.memory_space<vmem>>, vector<8x8x128xf32>
    tpu.vector_store %arg4[%c0_5, %c0_6, %c0_7], %3 {strides = array<i32>} : memref<8x8x128xf32, #tpu.memory_space<vmem>>, vector<8x8x128xf32>,
    return
  }
  func.func @transform_0(%arg0: i32, %arg1: i32) -> (i32, i32, i32) {
    %c0_i32 = arith.constant 0 : i32
    %c0_i32_0 = arith.constant 0 : i32
    %c0_i32_1 = arith.constant 0 : i32
    return %arg0, %c0_i32, %c0_i32_0 : i32, i32, i32
  }
  func.func @transform_1(%arg0: i32, %arg1: i32) -> (i32, i32, i32) {
    %c0_i32 = arith.constant 0 : i32
    %c0_i32_0 = arith.constant 0 : i32
    return %arg0, %arg1, %c0_i32 : i32, i32, i32
  }
  func.func @transform_2(%arg0: i32, %arg1: i32) -> (i32, i32, i32) {
    %c0_i32 = arith.constant 0 : i32
    %c0_i32_0 = arith.constant 0 : i32
    return %arg0, %arg1, %c0_i32 : i32, i32, i32
  }
}

</mosaic_0001>

<bundles_post_ra>
// kernel: tpu_custom_call.1
= control target key start
LH: loop header
LB: loop body
LE: loop exit
PB: predicated region body
PF: predicated region fallthrough
CT: control target
= control target key end

     0   :  { %7 = vsyncpa [#allocation3], 0  ;;  %s284_s0 = inlined_call_operand.vmem [shape: f32[8,1,1], index: 0, kind: input, shape index: {}]   ;;  %s285_s1 = inlined_call_operand.hbm [shape: f32[8,8,128], index: 1, kind: input, shape index: {}]   ;;  %s286_s2 = inlined_call_operand.hbm [shape: f32[8,8,128], index: 2, kind: output, shape index: {}]  }
   0x1   :  { %8 = vsyncpa [#allocation4], 0  ;;  %s210_s9 = smov [#allocation2]   ;;  %s162_s13 = scalar_lea.hbm %s285_s1, 1024 }
   0x2   :  { %s16_s10 = sshll.u32 %s210_s9, 4  ;;  %p163_p0 = scmp.ne.s32.totalorder %s285_s1, %s162_s13  ;;  %s17_s10 = int_to_ptr.vmem [resolvable:$true] %s16_s10 }
   0x3   :  { %p166_p1 = scmp.lt.u32.totalorder %s162_s13, %s285_s1 }
   0x5   :  { %p168_p2 = pnand %p166_p1, %p163_p0 }
   0x7   :  { %171 = shalt.err (!%p168_p2)
}
   0x8   :  { %s172_s18 = scalar_lea.vmem %s17_s10, 1024  ;;  %p177_p4 = scmp.lt.s32.totalorder %s17_s10, %s17_s10 }
   0x9   :  { %p173_p3 = scmp.ne.s32.totalorder %s17_s10, %s172_s18  ;;  %p178_p5 = scmp.lt.s32.totalorder %s172_s18, %s172_s18 }
   0xb   :  { %p179_p6 = por %p178_p5, %p177_p4 }
   0xd   :  { %p180_p7 = pnand %p179_p6, %p173_p3 }
   0xf   :  { %183 = shalt.err (!%p180_p7)
}
  0x10   :  { %s211_s19 = smov 128   ;;  %s212_s20 = smov 8  }
  0x11   :  { %22 = dma.hbm_to_vmem [thread:$0]  %s285_s1, 1024, %s17_s10, [#allocation3], %s211_s19, %s211_s19, %s212_s20  }
  0x12   :  { %206 = dma.done.wait [#allocation3], 1024  }
  0x13   :  { %207 = vsyncadd [#allocation3], 4294966272  ;;  %v213_v0 = vmov 0   ;;  %v149_v1 = vld [vmem:[%s284_s0 + $0x2] ss:$0 sm:$0xff]  ;;  %v28_v9 = vld [vmem:[#allocation2 + $0x10] sm:$0xff] }
  0x14   :  { %161 = vset.pattern.permute.xlu1 %v213_v0  ;;  %160 = vset.pattern.permute.xlu0 %v213_v0  ;;  %v147_v2 = vld [vmem:[%s284_s0] ss:$0 sm:$0xff]  ;;  %v150_v3 = vld [vmem:[%s284_s0 + $0x3] ss:$0 sm:$0xff]  ;;  %v148_v4 = vld [vmem:[%s284_s0 + $0x1] ss:$0 sm:$0xff] }
  0x15   :  { %91 = vperm.xlu1 %161, %v149_v1   ;;  %83 = vperm.xlu0 %160, %v147_v2   ;;  %v152_v5 = vld [vmem:[%s284_s0 + $0x5] ss:$0 sm:$0xff]  ;;  %v151_v6 = vld [vmem:[%s284_s0 + $0x4] ss:$0 sm:$0xff]  ;;  %v154_v7 = vld [vmem:[%s284_s0 + $0x7] ss:$0 sm:$0xff] }
  0x16   :  { %v153_v8 = vld [vmem:[%s284_s0 + $0x6] ss:$0 sm:$0xff]  ;;  %v29_v15 = vld [vmem:[#allocation2 + $0x18] sm:$0xff]  ;;  %v27_v16 = vld [vmem:[#allocation2 + $0x8] sm:$0xff]  ;;  %s214_s0 = smov [#allocation5]  }
  0x17   :  { %v26_v10 = vld [vmem:[#allocation2] sm:$0xff]  ;;  %v31_v21 = vld [vmem:[#allocation2 + $0x28] sm:$0xff]  ;;  %v33_v27 = vld [vmem:[#allocation2 + $0x38] sm:$0xff]  ;;  %s135_s10 = sshll.u32 %s214_s0, 4  ;;  %s136_s10 = int_to_ptr.vmem [resolvable:$true] %s135_s10 }
  0x18   :  { %v30_v22 = vld [vmem:[#allocation2 + $0x20] sm:$0xff]  ;;  %v32_v28 = vld [vmem:[#allocation2 + $0x30] sm:$0xff]  ;;  %s184_s11 = scalar_lea.vmem %s136_s10, 1024  ;;  %p189_p9 = scmp.lt.s32.totalorder %s136_s10, %s136_s10 }
  0x19   :  { %95 = vperm.xlu1 %161, %v150_v3   ;;  %87 = vperm.xlu0 %160, %v148_v4   ;;  %p185_p8 = scmp.ne.s32.totalorder %s136_s10, %s184_s11  ;;  %p190_p10 = scmp.lt.s32.totalorder %s184_s11, %s184_s11 }
  0x1b   :  { %p191_p11 = por %p190_p10, %p189_p9 }
  0x1d   :  { %103 = vperm.xlu1 %161, %v152_v5   ;;  %99 = vperm.xlu0 %160, %v151_v6   ;;  %p192_p12 = pnand %p191_p11, %p185_p8 }
  0x21   :  { %111 = vperm.xlu1 %161, %v154_v7   ;;  %107 = vperm.xlu0 %160, %v153_v8  }
  0x94   :  { %v92_v11 = vpop.permute.xlu1 %91  ;;  %v84_v12 = vpop.permute.xlu0 %83 }
  0x95   :  { %v116_v13 = vmul.f32 %v92_v11, %v28_v9  ;;  %v114_v14 = vmul.f32 %v84_v12, %v26_v10 }
  0x97   :  { %124 = vst [vmem:[#allocation5 + $0x10] sm:$0xff] %v116_v13  ;;  %122 = vst [vmem:[#allocation5] sm:$0xff] %v114_v14 }
  0x98   :  { %v96_v17 = vpop.permute.xlu1 %95  ;;  %v88_v18 = vpop.permute.xlu0 %87 }
  0x99   :  { %v117_v19 = vmul.f32 %v96_v17, %v29_v15  ;;  %v115_v20 = vmul.f32 %v88_v18, %v27_v16 }
  0x9b   :  { %125 = vst [vmem:[#allocation5 + $0x18] sm:$0xff] %v117_v19  ;;  %123 = vst [vmem:[#allocation5 + $0x8] sm:$0xff] %v115_v20 }
  0x9c   :  { %v104_v23 = vpop.permute.xlu1 %103  ;;  %v100_v24 = vpop.permute.xlu0 %99 }
  0x9d   :  { %v119_v25 = vmul.f32 %v104_v23, %v31_v21  ;;  %v118_v26 = vmul.f32 %v100_v24, %v30_v22 }
  0x9f   :  { %127 = vst [vmem:[#allocation5 + $0x28] sm:$0xff] %v119_v25  ;;  %126 = vst [vmem:[#allocation5 + $0x20] sm:$0xff] %v118_v26 }
  0xa0   :  { %v112_v29 = vpop.permute.xlu1 %111  ;;  %v108_v30 = vpop.permute.xlu0 %107 }
  0xa1   :  { %v121_v31 = vmul.f32 %v112_v29, %v33_v27  ;;  %v120_v32 = vmul.f32 %v108_v30, %v32_v28 }
  0xa3   :  { %129 = vst [vmem:[#allocation5 + $0x38] sm:$0xff] %v121_v31  ;;  %128 = vst [vmem:[#allocation5 + $0x30] sm:$0xff] %v120_v32 }
  0xa4   :  { %195 = shalt.err (!%p192_p12)
}
  0xa5   :  { %s196_s14 = scalar_lea.hbm %s286_s2, 1024 }
  0xa6   :  { %p197_p13 = scmp.ne.s32.totalorder %s286_s2, %s196_s14  ;;  %p200_p0 = scmp.lt.u32.totalorder %s196_s14, %s286_s2 }
  0xa8   :  { %p202_p1 = pnand %p200_p0, %p197_p13 }
  0xaa   :  { %205 = shalt.err (!%p202_p1)
}
  0xab   :  { %141 = dma.vmem_to_hbm [thread:$0]  %s136_s10, 1024, %s286_s2, [#allocation4], %s211_s19, %s211_s19, %s212_s20  }
  0xac   :  { %208 = dma.done.wait [#allocation4], 1024  }
  0xad   :  { %209 = vsyncadd [#allocation4], 4294966272 }
  0xae   :  { %145 = vsyncpa [#allocation3], 1 }
  0xaf   :  { %146 = vsyncpa [#allocation4], 1 }

</bundles_post_ra>
